<compile_context>
chip_gen: v6e
topology: v6e:2x2x1
jax: 0.10.0
libtpu: 0.0.40
codegen_flags: <defaults>
</compile_context>

<pallas_src>
import functools

import jax
import jax.numpy as jnp
from jax.experimental import pallas as pl
from jax.experimental.pallas import tpu as pltpu


def _make_layer_kernel(C, H, W, Cout):
    HW = H * W

    def kernel(xf_ref, wt_ref, wm_ref, out_ref):
        # xf_ref : (1, C, (H+2)*W + 2)  H-padded, flattened, edge-padded image (NCHW order)
        # wt_ref : (9, Cout, C)         folded effective weights, tap k = dh*3 + dw
        # wm_ref : (2, HW)              [left-valid, right-valid] column masks (0/1)
        # out_ref: (1, Cout, HW)        lane-dense output slab (reshaped to NCHW outside)
        wl = wm_ref[0:1, :]   # zero where w == 0      (needed for dw == 0 taps)
        wr = wm_ref[1:2, :]   # zero where w == W - 1  (needed for dw == 2 taps)

        acc = jnp.zeros((Cout, HW), jnp.float32)
        for dh in range(3):
            for dw in range(3):
                s = dh * W + dw                       # static slide offset
                xs = xf_ref[0, :, s:s + HW]           # (C, HW) shifted window
                if dw == 0:
                    xs = xs * wl
                elif dw == 2:
                    xs = xs * wr
                acc = acc + jnp.dot(wt_ref[dh * 3 + dw], xs,
                                    preferred_element_type=jnp.float32)

        out_ref[...] = acc[None].astype(out_ref.dtype)

    return kernel


@functools.partial(jax.jit, static_argnames=("compute_dtype",))
def layer_forward(x, alphas, w3_cells, w1_cells, *, compute_dtype=jnp.bfloat16):
    """x: (N, Cin, H, W) f32 (NCHW), alphas: (2, 2) f32,
    w3_cells: 2x (Ch, Cin, 3, 3), w1_cells: 2x (Ch, Cin, 1, 1).  Returns NCHW (N, 2*Ch, H, W) f32."""
    N, C, H, W = x.shape
    Ch = w3_cells[0].shape[0]
    Cout = 2 * Ch
    HW = H * W
    Lf = (H + 2) * W + 2

    # ---- Fold the 1x1 path + alphas into a single effective 3x3 weight (one GEMM). ----
    w3_all = jnp.concatenate([w.astype(jnp.float32) for w in w3_cells], axis=0)  # (Cout, C, 3, 3)
    w1_all = jnp.concatenate([w.astype(jnp.float32) for w in w1_cells], axis=0)  # (Cout, C, 1, 1)
    s3 = jnp.repeat(1.0 + alphas[:, 0], Ch)   # (Cout,)  (1 + a[cell, 0])
    s1 = jnp.repeat(alphas[:, 1], Ch)         # (Cout,)  a[cell, 1]
    w_eff = w3_all * s3[:, None, None, None]
    w_eff = w_eff.at[:, :, 1, 1].add(s1[:, None] * w1_all[:, :, 0, 0])
    # (9, Cout, C): transposed so the GEMM emits channels on sublanes / H*W on lanes.
    w_t = jnp.transpose(w_eff, (2, 3, 0, 1)).reshape(9, Cout, C).astype(compute_dtype)

    # ---- Input prep (no transpose, ~1x traffic): pad H by 1, flatten (H, W), pad ends. ----
    xf = jnp.pad(x, ((0, 0), (0, 0), (1, 1), (0, 0)))            # (N, C, H+2, W)
    xf = xf.reshape(N, C, (H + 2) * W)
    xf = jnp.pad(xf, ((0, 0), (0, 0), (1, 1))).astype(compute_dtype)   # (N, C, Lf)

    # ---- W-boundary validity masks for the shifted windows. ----
    colw = jnp.arange(HW, dtype=jnp.int32) % W
    wmask = jnp.stack([(colw != 0), (colw != W - 1)]).astype(compute_dtype)  # (2, HW)

    kernel = _make_layer_kernel(C, H, W, Cout)
    out = pl.pallas_call(
        kernel,
        out_shape=jax.ShapeDtypeStruct((N, Cout, HW), jnp.float32),
        grid=(N,),
        in_specs=[
            pl.BlockSpec((1, C, Lf), lambda n: (n, 0, 0)),
            pl.BlockSpec((9, Cout, C), lambda n: (0, 0, 0)),   # resident across the grid
            pl.BlockSpec((2, HW), lambda n: (0, 0)),           # resident across the grid
        ],
        out_specs=pl.BlockSpec((1, Cout, HW), lambda n: (n, 0, 0)),
        compiler_params=pltpu.CompilerParams(
            dimension_semantics=("parallel",),
            vmem_limit_bytes=32 * 1024 * 1024,
        ),
    )(xf, w_t, wmask)

    # (N, Cout, H*W) -> (N, Cout, H, W): trailing-dim split, no transpose needed.
    return out.reshape(N, Cout, H, W)


def _reference_forward(x, alphas, w3_cells, w1_cells):
    outs = []
    for i in range(2):
        y3 = jax.lax.conv_general_dilated(
            x, w3_cells[i], (1, 1), ((1, 1), (1, 1)),
            dimension_numbers=("NCHW", "OIHW", "NCHW"))
        y1 = jax.lax.conv_general_dilated(
            x, w1_cells[i], (1, 1), ((0, 0), (0, 0)),
            dimension_numbers=("NCHW", "OIHW", "NCHW"))
        outs.append((1.0 + alphas[i, 0]) * y3 + alphas[i, 1] * y1)
    return jnp.concatenate(outs, axis=1)


if __name__ == "__main__":
    # Small shapes consistent with the module: inputChannel=3, outputChannel=32,
    # numOfInnerCell=2 -> each inner cell produces 16 channels.
    N, Cin, H, W = 2, 3, 16, 16
    Cout = 32
    Ch = Cout // 2

    key = jax.random.PRNGKey(0)
    kx, ka, k0, k1, k2, k3 = jax.random.split(key, 6)
    x = jax.random.normal(kx, (N, Cin, H, W), jnp.float32)
    alphas = jax.random.uniform(ka, (2, 2), jnp.float32)  # alphas[cell][op]

    w3_cells = [
        0.1 * jax.random.normal(k0, (Ch, Cin, 3, 3), jnp.float32),
        0.1 * jax.random.normal(k1, (Ch, Cin, 3, 3), jnp.float32),
    ]
    w1_cells = [
        0.1 * jax.random.normal(k2, (Ch, Cin, 1, 1), jnp.float32),
        0.1 * jax.random.normal(k3, (Ch, Cin, 1, 1), jnp.float32),
    ]

    ref = jax.block_until_ready(_reference_forward(x, alphas, w3_cells, w1_cells))

    # f32 compute path: tight numerical check of the implicit-GEMM structure.
    out_f32 = jax.block_until_ready(
        layer_forward(x, alphas, w3_cells, w1_cells, compute_dtype=jnp.float32))
    assert out_f32.shape == (N, Cout, H, W), out_f32.shape
    err32 = float(jnp.max(jnp.abs(out_f32 - ref)))
    assert err32 < 1e-4, err32

    # bf16 compute path (default, per perf feedback): f32 accumulation, looser tolerance.
    out_bf16 = jax.block_until_ready(layer_forward(x, alphas, w3_cells, w1_cells))
    assert out_bf16.shape == (N, Cout, H, W), out_bf16.shape
    err16 = float(jnp.max(jnp.abs(out_bf16 - ref)))
    assert err16 < 1e-1, err16

    print("KERNEL_OK")
</pallas_src>

<mosaic_0001>
module attributes {stable_mosaic.version = 11 : i64} {
  func.func @kernel(%arg0: i32, %arg1: memref<1x3x290xf32, #tpu.memory_space<vmem>>, %arg2: memref<9x32x3xf32, #tpu.memory_space<vmem>>, %arg3: memref<2x256xf32, #tpu.memory_space<vmem>>, %arg4: memref<1x32x256xf32, #tpu.memory_space<vmem>>) attributes {dimension_semantics = [#tpu.dimension_semantics<parallel>], iteration_bounds = array<i64: 2>, scalar_prefetch = 0 : i64, scratch_operands = 0 : i64, tpu.core_type = #tpu.core_type<tc>, window_params = [{transform_indices = @transform_0, window_bounds = array<i64: 1, 3, 290>}, {pipeline_mode = #tpu.pipeline_mode<synchronous>, transform_indices = @transform_1, window_bounds = array<i64: 9, 32, 3>}, {pipeline_mode = #tpu.pipeline_mode<synchronous>, transform_indices = @transform_2, window_bounds = array<i64: 2, 256>}, {transform_indices = @transform_3, window_bounds = array<i64: 1, 32, 256>}]} {
    %c0 = arith.constant 0 : index
    %c0_0 = arith.constant 0 : index
    %0 = vector.load %arg3[%c0, %c0_0] : memref<2x256xf32, #tpu.memory_space<vmem>>, vector<1x256xf32>
    %c1 = arith.constant 1 : index
    %c0_1 = arith.constant 0 : index
    %1 = vector.load %arg3[%c1, %c0_1] : memref<2x256xf32, #tpu.memory_space<vmem>>, vector<1x256xf32>
    %cst = arith.constant 0.000000e+00 : f32
    %2 = vector.broadcast %cst : f32 to vector<32x256xf32>
    %c0_2 = arith.constant 0 : index
    %c0_3 = arith.constant 0 : index
    %c0_4 = arith.constant 0 : index
    %3 = vector.load %arg1[%c0_2, %c0_3, %c0_4] : memref<1x3x290xf32, #tpu.memory_space<vmem>>, vector<1x3x256xf32>
    %4 = vector.shape_cast %3 : vector<1x3x256xf32> to vector<3x256xf32>
    %5 = vector.broadcast %0 : vector<1x256xf32> to vector<3x256xf32>
    %6 = arith.mulf %4, %5 : vector<3x256xf32>
    %c0_5 = arith.constant 0 : index
    %c0_6 = arith.constant 0 : index
    %c0_7 = arith.constant 0 : index
    %7 = vector.load %arg2[%c0_5, %c0_6, %c0_7] : memref<9x32x3xf32, #tpu.memory_space<vmem>>, vector<1x32x3xf32>
    %8 = vector.shape_cast %7 : vector<1x32x3xf32> to vector<32x3xf32>
    %cst_8 = arith.constant dense<0.000000e+00> : vector<32x256xf32>
    %9 = tpu.matmul %8, %6, %cst_8 {dimension_numbers = #tpu.dot_dimension_numbers<[1], [0], [0], [1], [0, 0, 1, 1], [], []>} : vector<32x3xf32>, vector<3x256xf32>, vector<32x256xf32> -> vector<32x256xf32>
    %10 = arith.addf %2, %9 : vector<32x256xf32>
    %c0_9 = arith.constant 0 : index
    %c0_10 = arith.constant 0 : index
    %c1_11 = arith.constant 1 : index
    %11 = vector.load %arg1[%c0_9, %c0_10, %c1_11] : memref<1x3x290xf32, #tpu.memory_space<vmem>>, vector<1x3x256xf32>
    %12 = vector.shape_cast %11 : vector<1x3x256xf32> to vector<3x256xf32>
    %c1_12 = arith.constant 1 : index
    %c0_13 = arith.constant 0 : index
    %c0_14 = arith.constant 0 : index
    %13 = vector.load %arg2[%c1_12, %c0_13, %c0_14] : memref<9x32x3xf32, #tpu.memory_space<vmem>>, vector<1x32x3xf32>
    %14 = vector.shape_cast %13 : vector<1x32x3xf32> to vector<32x3xf32>
    %cst_15 = arith.constant dense<0.000000e+00> : vector<32x256xf32>
    %15 = tpu.matmul %14, %12, %cst_15 {dimension_numbers = #tpu.dot_dimension_numbers<[1], [0], [0], [1], [0, 0, 1, 1], [], []>} : vector<32x3xf32>, vector<3x256xf32>, vector<32x256xf32> -> vector<32x256xf32>
    %16 = arith.addf %10, %15 : vector<32x256xf32>
    %c0_16 = arith.constant 0 : index
    %c0_17 = arith.constant 0 : index
    %c2 = arith.constant 2 : index
    %17 = vector.load %arg1[%c0_16, %c0_17, %c2] : memref<1x3x290xf32, #tpu.memory_space<vmem>>, vector<1x3x256xf32>
    %18 = vector.shape_cast %17 : vector<1x3x256xf32> to vector<3x256xf32>
    %19 = vector.broadcast %1 : vector<1x256xf32> to vector<3x256xf32>
    %20 = arith.mulf %18, %19 : vector<3x256xf32>
    %c2_18 = arith.constant 2 : index
    %c0_19 = arith.constant 0 : index
    %c0_20 = arith.constant 0 : index
    %21 = vector.load %arg2[%c2_18, %c0_19, %c0_20] : memref<9x32x3xf32, #tpu.memory_space<vmem>>, vector<1x32x3xf32>
    %22 = vector.shape_cast %21 : vector<1x32x3xf32> to vector<32x3xf32>
    %cst_21 = arith.constant dense<0.000000e+00> : vector<32x256xf32>
    %23 = tpu.matmul %22, %20, %cst_21 {dimension_numbers = #tpu.dot_dimension_numbers<[1], [0], [0], [1], [0, 0, 1, 1], [], []>} : vector<32x3xf32>, vector<3x256xf32>, vector<32x256xf32> -> vector<32x256xf32>
    %24 = arith.addf %16, %23 : vector<32x256xf32>
    %c0_22 = arith.constant 0 : index
    %c0_23 = arith.constant 0 : index
    %c16 = arith.constant 16 : index
    %25 = vector.load %arg1[%c0_22, %c0_23, %c16] : memref<1x3x290xf32, #tpu.memory_space<vmem>>, vector<1x3x256xf32>
    %26 = vector.shape_cast %25 : vector<1x3x256xf32> to vector<3x256xf32>
    %27 = vector.broadcast %0 : vector<1x256xf32> to vector<3x256xf32>
    %28 = arith.mulf %26, %27 : vector<3x256xf32>
    %c3 = arith.constant 3 : index
    %c0_24 = arith.constant 0 : index
    %c0_25 = arith.constant 0 : index
    %29 = vector.load %arg2[%c3, %c0_24, %c0_25] : memref<9x32x3xf32, #tpu.memory_space<vmem>>, vector<1x32x3xf32>
    %30 = vector.shape_cast %29 : vector<1x32x3xf32> to vector<32x3xf32>
    %cst_26 = arith.constant dense<0.000000e+00> : vector<32x256xf32>
    %31 = tpu.matmul %30, %28, %cst_26 {dimension_numbers = #tpu.dot_dimension_numbers<[1], [0], [0], [1], [0, 0, 1, 1], [], []>} : vector<32x3xf32>, vector<3x256xf32>, vector<32x256xf32> -> vector<32x256xf32>
    %32 = arith.addf %24, %31 : vector<32x256xf32>
    %c0_27 = arith.constant 0 : index
    %c0_28 = arith.constant 0 : index
    %c17 = arith.constant 17 : index
    %33 = vector.load %arg1[%c0_27, %c0_28, %c17] : memref<1x3x290xf32, #tpu.memory_space<vmem>>, vector<1x3x256xf32>
    %34 = vector.shape_cast %33 : vector<1x3x256xf32> to vector<3x256xf32>
    %c4 = arith.constant 4 : index
    %c0_29 = arith.constant 0 : index
    %c0_30 = arith.constant 0 : index
    %35 = vector.load %arg2[%c4, %c0_29, %c0_30] : memref<9x32x3xf32, #tpu.memory_space<vmem>>, vector<1x32x3xf32>
    %36 = vector.shape_cast %35 : vector<1x32x3xf32> to vector<32x3xf32>
    %cst_31 = arith.constant dense<0.000000e+00> : vector<32x256xf32>
    %37 = tpu.matmul %36, %34, %cst_31 {dimension_numbers = #tpu.dot_dimension_numbers<[1], [0], [0], [1], [0, 0, 1, 1], [], []>} : vector<32x3xf32>, vector<3x256xf32>, vector<32x256xf32> -> vector<32x256xf32>
    %38 = arith.addf %32, %37 : vector<32x256xf32>
    %c0_32 = arith.constant 0 : index
    %c0_33 = arith.constant 0 : index
    %c18 = arith.constant 18 : index
    %39 = vector.load %arg1[%c0_32, %c0_33, %c18] : memref<1x3x290xf32, #tpu.memory_space<vmem>>, vector<1x3x256xf32>
    %40 = vector.shape_cast %39 : vector<1x3x256xf32> to vector<3x256xf32>
    %41 = vector.broadcast %1 : vector<1x256xf32> to vector<3x256xf32>
    %42 = arith.mulf %40, %41 : vector<3x256xf32>
    %c5 = arith.constant 5 : index
    %c0_34 = arith.constant 0 : index
    %c0_35 = arith.constant 0 : index
    %43 = vector.load %arg2[%c5, %c0_34, %c0_35] : memref<9x32x3xf32, #tpu.memory_space<vmem>>, vector<1x32x3xf32>
    %44 = vector.shape_cast %43 : vector<1x32x3xf32> to vector<32x3xf32>
    %cst_36 = arith.constant dense<0.000000e+00> : vector<32x256xf32>
    %45 = tpu.matmul %44, %42, %cst_36 {dimension_numbers = #tpu.dot_dimension_numbers<[1], [0], [0], [1], [0, 0, 1, 1], [], []>} : vector<32x3xf32>, vector<3x256xf32>, vector<32x256xf32> -> vector<32x256xf32>
    %46 = arith.addf %38, %45 : vector<32x256xf32>
    %c0_37 = arith.constant 0 : index
    %c0_38 = arith.constant 0 : index
    %c32 = arith.constant 32 : index
    %47 = vector.load %arg1[%c0_37, %c0_38, %c32] : memref<1x3x290xf32, #tpu.memory_space<vmem>>, vector<1x3x256xf32>
    %48 = vector.shape_cast %47 : vector<1x3x256xf32> to vector<3x256xf32>
    %49 = vector.broadcast %0 : vector<1x256xf32> to vector<3x256xf32>
    %50 = arith.mulf %48, %49 : vector<3x256xf32>
    %c6 = arith.constant 6 : index
    %c0_39 = arith.constant 0 : index
    %c0_40 = arith.constant 0 : index
    %51 = vector.load %arg2[%c6, %c0_39, %c0_40] : memref<9x32x3xf32, #tpu.memory_space<vmem>>, vector<1x32x3xf32>
    %52 = vector.shape_cast %51 : vector<1x32x3xf32> to vector<32x3xf32>
    %cst_41 = arith.constant dense<0.000000e+00> : vector<32x256xf32>
    %53 = tpu.matmul %52, %50, %cst_41 {dimension_numbers = #tpu.dot_dimension_numbers<[1], [0], [0], [1], [0, 0, 1, 1], [], []>} : vector<32x3xf32>, vector<3x256xf32>, vector<32x256xf32> -> vector<32x256xf32>
    %54 = arith.addf %46, %53 : vector<32x256xf32>
    %c0_42 = arith.constant 0 : index
    %c0_43 = arith.constant 0 : index
    %c33 = arith.constant 33 : index
    %55 = vector.load %arg1[%c0_42, %c0_43, %c33] : memref<1x3x290xf32, #tpu.memory_space<vmem>>, vector<1x3x256xf32>
    %56 = vector.shape_cast %55 : vector<1x3x256xf32> to vector<3x256xf32>
    %c7 = arith.constant 7 : index
    %c0_44 = arith.constant 0 : index
    %c0_45 = arith.constant 0 : index
    %57 = vector.load %arg2[%c7, %c0_44, %c0_45] : memref<9x32x3xf32, #tpu.memory_space<vmem>>, vector<1x32x3xf32>
    %58 = vector.shape_cast %57 : vector<1x32x3xf32> to vector<32x3xf32>
    %cst_46 = arith.constant dense<0.000000e+00> : vector<32x256xf32>
    %59 = tpu.matmul %58, %56, %cst_46 {dimension_numbers = #tpu.dot_dimension_numbers<[1], [0], [0], [1], [0, 0, 1, 1], [], []>} : vector<32x3xf32>, vector<3x256xf32>, vector<32x256xf32> -> vector<32x256xf32>
    %60 = arith.addf %54, %59 : vector<32x256xf32>
    %c0_47 = arith.constant 0 : index
    %c0_48 = arith.constant 0 : index
    %c34 = arith.constant 34 : index
    %61 = vector.load %arg1[%c0_47, %c0_48, %c34] : memref<1x3x290xf32, #tpu.memory_space<vmem>>, vector<1x3x256xf32>
    %62 = vector.shape_cast %61 : vector<1x3x256xf32> to vector<3x256xf32>
    %63 = vector.broadcast %1 : vector<1x256xf32> to vector<3x256xf32>
    %64 = arith.mulf %62, %63 : vector<3x256xf32>
    %c8 = arith.constant 8 : index
    %c0_49 = arith.constant 0 : index
    %c0_50 = arith.constant 0 : index
    %65 = vector.load %arg2[%c8, %c0_49, %c0_50] : memref<9x32x3xf32, #tpu.memory_space<vmem>>, vector<1x32x3xf32>
    %66 = vector.shape_cast %65 : vector<1x32x3xf32> to vector<32x3xf32>
    %cst_51 = arith.constant dense<0.000000e+00> : vector<32x256xf32>
    %67 = tpu.matmul %66, %64, %cst_51 {dimension_numbers = #tpu.dot_dimension_numbers<[1], [0], [0], [1], [0, 0, 1, 1], [], []>} : vector<32x3xf32>, vector<3x256xf32>, vector<32x256xf32> -> vector<32x256xf32>
    %68 = arith.addf %60, %67 : vector<32x256xf32>
    %69 = vector.shape_cast %68 : vector<32x256xf32> to vector<1x32x256xf32>
    %c0_52 = arith.constant 0 : index
    %c0_53 = arith.constant 0 : index
    %c0_54 = arith.constant 0 : index
    %70 = vector.load %arg4[%c0_52, %c0_53, %c0_54] : memref<1x32x256xf32, #tpu.memory_space<vmem>>, vector<1x32x256xf32>
    tpu.vector_store %arg4[%c0_52, %c0_53, %c0_54], %69 {strides = array<i32>} : memref<1x32x256xf32, #tpu.memory_space<vmem>>, vector<1x32x256xf32>,
    return
  }
  func.func @transform_0(%arg0: i32) -> (i32, i32, i32) {
    %c0_i32 = arith.constant 0 : i32
    %c0_i32_0 = arith.constant 0 : i32
    %c0_i32_1 = arith.constant 0 : i32
    return %arg0, %c0_i32, %c0_i32_0 : i32, i32, i32
  }
  func.func @transform_1(%arg0: i32) -> (i32, i32, i32) {
    %c0_i32 = arith.constant 0 : i32
    %c0_i32_0 = arith.constant 0 : i32
    %c0_i32_1 = arith.constant 0 : i32
    %c0_i32_2 = arith.constant 0 : i32
    return %c0_i32, %c0_i32_0, %c0_i32_1 : i32, i32, i32
  }
  func.func @transform_2(%arg0: i32) -> (i32, i32) {
    %c0_i32 = arith.constant 0 : i32
    %c0_i32_0 = arith.constant 0 : i32
    %c0_i32_1 = arith.constant 0 : i32
    return %c0_i32, %c0_i32_0 : i32, i32
  }
  func.func @transform_3(%arg0: i32) -> (i32, i32, i32) {
    %c0_i32 = arith.constant 0 : i32
    %c0_i32_0 = arith.constant 0 : i32
    %c0_i32_1 = arith.constant 0 : i32
    return %arg0, %c0_i32, %c0_i32_0 : i32, i32, i32
  }
}

</mosaic_0001>

<bundles_post_ra>
// kernel: layer_forward.1
= control target key start
LH: loop header
LB: loop body
LE: loop exit
PB: predicated region body
PF: predicated region fallthrough
CT: control target
= control target key end

     0   :  { %s1633_s12 = smov 0   ;;  %s1959_s0 = inlined_call_operand.vmem [shape: f32[2,3,290], index: 0, kind: input, shape index: {}]   ;;  %s1960_s1 = inlined_call_operand.vmem [shape: f32[9,32,3], index: 1, kind: input, shape index: {}]   ;;  %s1961_s2 = inlined_call_operand.vmem [shape: f32[2,256], index: 2, kind: input, shape index: {}]   ;;  %s1962_s3 = inlined_call_operand.vmem [shape: f32[2,32,256], index: 3, kind: output, shape index: {}]  }
   0x1 LB: > { %s1465_s13 = sadd.s32 4294967295, %s1597_s12   ;;  %p1469_p0 = scmp.ge.s32.totalorder %s1597_s12, 1  ;;  %s1597_s12 = sphi %s1633_s12, %s13_s12  }
   0x2   : > { %p137_p1 = scmp.lt.s32.totalorder %s1597_s12, 3 }
   0x4   : > { %p138_p2 = pnand %p1469_p0, %p137_p1 }
   0x6   : > { %141 = sbr.rel (%p138_p2) target bundleno = 522 (0x20a), region = 32 }
   0xb   : > { %v176_v0 = vlaneseq  ;;  %p161_p3 = scmp.lt.s32.totalorder %s1465_s13, 1  ;;  %v1473_v2 = vld [vmem:[%s1961_s2 + $0x1] ss:$2 sm:$0x3]  ;;  %s1599_s22 = smov 2   ;;  %v1605_v16 = vmov 0.0  }
   0xc   : > { %v171_v3 = vld [vmem:[%s1961_s2] ss:$2 sm:$0x3]  ;;  %s1600_s23 = smov 18   ;;  %s1601_s24 = smov 16   ;;  %303 = vmatprep.mubr.f32.mxu1 %v1605_v16  ;;  %291 = vmatprep.mubr.f32.mxu0 %v1605_v16  ;;  %vm438_vm0 = vcmask 15360  }
   0xd   : > { %v177_v1 = vshrl.u32 %v176_v0, 7  ;;  %s1972_s13 = smov (!%p161_p3, %s1465_s13), 1  ;;  %s1602_s25 = smov 32   ;;  %vm579_vm1 = vcmask 130048   ;;  %vm206_vm2 = vcmask 1039360   ;;  %vm222_vm3 = vcmask 1042432  }
   0xe   : > { %s1565_s18 = smul.u32 12, %s1972_s13  ;;  %s1603_s26 = smov 34   ;;  %vm852_vm4 = vcmask 146432   ;;  %v1476_v43 = vld [vmem:[%s1960_s1 + $0x30] sm:$0xff]  ;;  %vm209_vm5 = vcmask 23552   ;;  %v1477_v50 = vld [vmem:[%s1960_s1 + $0x38] sm:$0xff] }
   0xf   : > { %v178_v4 = vsub.s32 0, %v177_v1  ;;  %v182_v5 = vsub.s32 1, %v177_v1  ;;  %s1604_s27 = smov 127   ;;  %s1606_s28 = smov 126   ;;  %vm993_vm6 = vcmask 261120   ;;  %v1474_v52 = vld [vmem:[%s1960_s1 + $0x20] sm:$0xff] }
  0x10   : > { %s1653_s21 = scalar_lea.vmem %s1959_s0, %s1565_s18  ;;  %s1607_s29 = smov 112   ;;  %v187_v56 = vld [vmem:[%s1960_s1] sm:$0xff]  ;;  %v1475_v58 = vld [vmem:[%s1960_s1 + $0x28] sm:$0xff]  ;;  %vm1266_vm7 = vcmask 277504   ;;  %vm458_vm8 = vcmask 1031168   ;;  %vm599_vm9 = vcmask 916480  }
  0x11   : > { %v429_v6 = vrot.slane %v1473_v2, %v178_v4  ;;  %v433_v7 = vrot.slane %v1473_v2, %v182_v5  ;;  %v179_v8 = vrot.slane %v171_v3, %v178_v4  ;;  %v183_v9 = vrot.slane %v171_v3, %v182_v5  ;;  %v174_v12 = vld [vmem:[%s1653_s21] sm:$0x77]  ;;  %v191_v15 = vld [vmem:[%s1653_s21 + $0x8] sm:$0x7]  ;;  %s1608_s7 = smov 111   ;;  %s1609_s14 = smov 110  }
  0x12   : > { %v199_v14 = vcombine.high %v174_v12, %v174_v12  ;;  %v424_v18 = vld [vmem:[%s1653_s21 + $0x8] sm:$0x7]  ;;  %v423_v20 = vld [vmem:[%s1653_s21] sm:$0x77]  ;;  %v189_v3 = vld [vmem:[%s1960_s1 + $0x10] sm:$0xff]  ;;  %vm731_vm10 = vcmask 908288  }
  0x13   : > { %v434_v10 = vcombine.low %v429_v6, %v433_v7  ;;  %v184_v11 = vcombine.low %v179_v8, %v183_v9  ;;  %v574_v27 = vld [vmem:[%s1653_s21] sm:$0x77]  ;;  %v575_v34 = vld [vmem:[%s1653_s21 + $0x8] sm:$0x7]  ;;  %v190_v7 = vld [vmem:[%s1960_s1 + $0x18] sm:$0xff]  ;;  %vm872_vm11 = vcmask 900096  }
  0x14   : > { %v715_v40 = vld [vmem:[%s1653_s21] sm:$0x77]  ;;  %v716_v47 = vld [vmem:[%s1653_s21 + $0x8] sm:$0x7]  ;;  %vm1013_vm12 = vcmask 785408   ;;  %vm1145_vm13 = vcmask 777216  }
  0x15   : > { %435 = vrot.lane.b32.xlu0 %v434_v10, %s1599_s22  ;;  %849 = vrot.lane.b32.xlu1 %v434_v10, %s1600_s23  ;;  %v1656_v13 = vmul.f32 %v184_v11, %v174_v12  ;;  %v847_v45 = vld [vmem:[%s1653_s21] sm:$0x77]  ;;  %v724_v48 = vcombine.high %v715_v40, %v715_v40  ;;  %v848_v53 = vld [vmem:[%s1653_s21 + $0x8] sm:$0x7]  ;;  %s1610_s22 = smov 96   ;;  %vm1286_vm14 = vcmask 769024  }
  0x16   : > { %v988_v54 = vld [vmem:[%s1653_s21] sm:$0x77]  ;;  %v989_v59 = vld [vmem:[%s1653_s21 + $0x8] sm:$0x7]  ;;  %s1562_s5 = sshll.u32 %s1972_s13, 6 }
  0x17   : > { %v317_v44 = vcombine.high %v1656_v13, %v1656_v13  ;;  %v188_v62 = vld [vmem:[%s1960_s1 + $0x8] sm:$0xff]  ;;  %v1129_v0 = vld [vmem:[%s1653_s21] sm:$0x77] }
  0x18   : > { %v1138_v4 = vcombine.high %v1129_v0, %v1129_v0  ;;  %v1261_v5 = vld [vmem:[%s1653_s21] sm:$0x77]  ;;  %v1262_v8 = vld [vmem:[%s1653_s21 + $0x8] sm:$0x7] }
  0x19   : > { %576 = vrot.lane.b32.xlu0 %v184_v11, %s1601_s24  ;;  %990 = vrot.lane.b32.xlu1 %v184_v11, %s1602_s25  ;;  %s1611_s25 = smov 95  }
  0x1d   : > { %1263 = vrot.lane.b32.xlu0 %v434_v10, %s1603_s26  ;;  %202 = vrot.lane.b32.xlu1 %v199_v14, %s1604_s27  ;;  %v1130_v10 = vld [vmem:[%s1653_s21 + $0x8] sm:$0x7]  ;;  %s1612_s26 = smov 94  }
  0x21   : > { %204 = vrot.lane.b32.xlu0 %v191_v15, %s1604_s27  ;;  %200 = vrot.lane.b32.xlu1 %v174_v12, %s1604_s27 }
  0x87   : > { %v436_v17 = vpop.permute.xlu0 %435  ;;  %v1662_v19 = vpop.permute.xlu1 %849 }
  0x88   : > { %v437_v21 = vrot.slane %v436_v17, 4  ;;  %v851_v36 = vrot.slane %v1662_v19, 4 }
  0x8a   : > { %v439_v22 = vsel %vm438_vm0, %v437_v21, %v436_v17  ;;  %v443_v23 = vmul.f32 %v437_v21, %v424_v18  ;;  %v853_v46 = vsel %vm852_vm4, %v851_v36, %v1662_v19  ;;  %v857_v60 = vmul.f32 %v851_v36, %v848_v53  ;;  %v1490_v19 = vld [vmem:[%s1960_s1 + $0x40] sm:$0xff]  ;;  %v1502_v36 = vld [vmem:[%s1960_s1 + $0x70] sm:$0xff] }
  0x8b   : > { %v442_v24 = vmul.f32 %v439_v22, %v423_v20  ;;  %v577_v25 = vpop.permute.xlu0 %576  ;;  %v1665_v26 = vpop.permute.xlu1 %990  ;;  %v856_v51 = vmul.f32 %v853_v46, %v847_v45  ;;  %v1511_v45 = vld [vmem:[%s1960_s1 + $0x88] sm:$0xff] }
  0x8c   : > { %v578_v28 = vrot.slane %v577_v25, 4  ;;  %456 = vrot.lane.b32.xlu1 %v443_v23, %s1606_s28  ;;  %v992_v49 = vrot.slane %v1665_v26, 4 }
  0x8d   : > { %v451_v29 = vcombine.high %v442_v24, %v442_v24  ;;  %v865_v57 = vcombine.high %v856_v51, %v856_v51 }
  0x8e   : > { %v580_v30 = vsel %vm579_vm1, %v578_v28, %v577_v25  ;;  %v584_v37 = vmul.f32 %v578_v28, %v575_v34  ;;  %v994_v55 = vsel %vm993_vm6, %v992_v49, %v1665_v26  ;;  %v998_v63 = vmul.f32 %v992_v49, %v989_v59  ;;  %v1500_v26 = vld [vmem:[%s1960_s1 + $0x60] sm:$0xff]  ;;  %v1493_v34 = vld [vmem:[%s1960_s1 + $0x58] sm:$0xff] }
  0x8f   : > { %v583_v31 = vmul.f32 %v580_v30, %v574_v27  ;;  %454 = vrot.lane.b32.xlu0 %v451_v29, %s1606_s28  ;;  %v1668_v32 = vpop.permute.xlu0 %1263  ;;  %v203_v33 = vpop.permute.xlu1 %202  ;;  %v997_v61 = vmul.f32 %v994_v55, %v988_v54  ;;  %v1492_v29 = vld [vmem:[%s1960_s1 + $0x50] sm:$0xff]  ;;  %v1513_v55 = vld [vmem:[%s1960_s1 + $0x98] sm:$0xff] }
  0x90   : > { %v1265_v2 = vrot.slane %v1668_v32, 4 }
  0x91   : > { %593 = vrot.lane.b32.xlu1 %v583_v31, %s1607_s29  ;;  %v592_v35 = vcombine.high %v583_v31, %v583_v31  ;;  %v1006_v1 = vcombine.high %v997_v61, %v997_v61  ;;  %v1501_v31 = vld [vmem:[%s1960_s1 + $0x68] sm:$0xff] }
  0x92   : > { %v1267_v6 = vsel %vm1266_vm7, %v1265_v2, %v1668_v32  ;;  %v1271_v11 = vmul.f32 %v1265_v2, %v1262_v8  ;;  %v1550_v8 = vld [vmem:[%s1960_s1 + $0x100] sm:$0xff] }
  0x93   : > { %452 = vrot.lane.b32.xlu0 %v442_v24, %s1606_s28  ;;  %v205_v38 = vpop.permute.xlu0 %204  ;;  %v201_v39 = vpop.permute.xlu1 %200  ;;  %v1270_v9 = vmul.f32 %v1267_v6, %v1261_v5  ;;  %v1491_v24 = vld [vmem:[%s1960_s1 + $0x48] sm:$0xff]  ;;  %v1533_v6 = vld [vmem:[%s1960_s1 + $0xd8] sm:$0xff] }
  0x94   : > { %v208_v41 = vsel %vm206_vm2, %v203_v33, %v205_v38  ;;  %v207_v42 = vsel %vm206_vm2, %v201_v39, %v203_v33  ;;  %v1541_v5 = vld [vmem:[%s1960_s1 + $0xe8] sm:$0xff] }
  0x95   : > { %595 = vrot.lane.b32.xlu1 %v592_v35, %s1607_s29  ;;  %1563 = vmatprep.subr.msk.mxu1 %vm222_vm3, %v208_v41  ;;  %v1279_v12 = vcombine.high %v1270_v9, %v1270_v9 }
  0x96   : > { %1564 = vmatpush1.msk.msra.mxu1 %vm222_vm3, %v207_v42  ;;  %1478 = vmatprep.subr.msk.mxu0 %vm222_vm3, %v208_v41 }
  0x97   : > { %597 = vrot.lane.b32.xlu0 %v584_v37, %s1607_s29  ;;  %1482 = vmatmul.mubr.msk.f32.vlgmr.msra.gmra.mxu1 %vm209_vm5, %v1476_v43 }
  0x98   : > { %309 = vmatprep.mubr.f32.mxu1 %v1605_v16  ;;  %1484 = vmatprep.subr.msk.mxu1 %vm222_vm3, %v317_v44 }
  0x99   : > { %729 = vrot.lane.b32.xlu1 %v716_v47, %s1608_s7  ;;  %1485 = vmatpush1.msk.msra.mxu1 %vm222_vm3, %v1656_v13  ;;  %v1520_v47 = vld [vmem:[%s1960_s1 + $0xa0] sm:$0xff] }
  0x9a   : > { %1479 = vmatpush1.msk.msra.mxu0 %vm222_vm3, %v207_v42  ;;  %v1503_v42 = vld [vmem:[%s1960_s1 + $0x78] sm:$0xff] }
  0x9b   : > { %727 = vrot.lane.b32.xlu0 %v724_v48, %s1608_s7  ;;  %1483 = vmatmul.mubr.msk.f32.gmra.mxu1 %vm209_vm5, %v1477_v50  ;;  %v1512_v50 = vld [vmem:[%s1960_s1 + $0x90] sm:$0xff] }
  0x9c   : > { %398 = vmatprep.mubr.f32.mxu1 %v1605_v16  ;;  %1480 = vmatmul.mubr.msk.f32.vlgmr.msra.gmra.mxu0 %vm209_vm5, %v1474_v52  ;;  %v1521_v52 = vld [vmem:[%s1960_s1 + $0xa8] sm:$0xff] }
  0x9d   : > { %866 = vrot.lane.b32.xlu1 %v856_v51, %s1609_s14  ;;  %297 = vmatprep.mubr.f32.mxu0 %v1605_v16 }
  0x9f   : > { %725 = vrot.lane.b32.xlu0 %v715_v40, %s1608_s7  ;;  %1486 = vmatmul.mubr.msk.f32.vlgmr.msra.gmra.mxu1 %vm209_vm5, %v187_v56  ;;  %v1510_v40 = vld [vmem:[%s1960_s1 + $0x80] sm:$0xff]  ;;  %s1938_s7 = scalar_lea.vmem %s1962_s3, %s1562_s5 }
  0xa0   : > { %404 = vmatprep.mubr.f32.mxu1 %v1605_v16  ;;  %1481 = vmatmul.mubr.msk.f32.gmra.mxu0 %vm209_vm5, %v1475_v58  ;;  %v1522_v58 = vld [vmem:[%s1960_s1 + $0xb0] sm:$0xff] }
  0xa1   : > { %868 = vrot.lane.b32.xlu1 %v865_v57, %s1609_s14  ;;  %541 = vmatprep.mubr.f32.mxu0 %v1605_v16 }
  0xa3   : > { %870 = vrot.lane.b32.xlu0 %v857_v60, %s1609_s14  ;;  %1487 = vmatmul.mubr.msk.f32.gmra.mxu1 %vm209_vm5, %v188_v62 }
  0xa4   : > { %410 = vmatprep.mubr.f32.mxu1 %v1605_v16 }
  0xa5   : > { %1011 = vrot.lane.b32.xlu1 %v998_v63, %s1610_s22  ;;  %v1523_v63 = vld [vmem:[%s1960_s1 + $0xb8] sm:$0xff] }
  0xa7   : > { %1009 = vrot.lane.b32.xlu0 %v1006_v1, %s1610_s22  ;;  %1488 = vmatmul.mubr.msk.f32.gmra.mxu1 %vm209_vm5, %v189_v3  ;;  %v1531_v1 = vld [vmem:[%s1960_s1 + $0xc8] sm:$0xff]  ;;  %v1540_v3 = vld [vmem:[%s1960_s1 + $0xe0] sm:$0xff] }
  0xa8   : > { %416 = vmatprep.mubr.f32.mxu1 %v1605_v16 }
  0xa9   : > { %1141 = vrot.lane.b32.xlu1 %v1138_v4, %s1611_s25  ;;  %v1532_v4 = vld [vmem:[%s1960_s1 + $0xd0] sm:$0xff] }
  0xab   : > { %1007 = vrot.lane.b32.xlu0 %v997_v61, %s1610_s22  ;;  %1489 = vmatmul.mubr.msk.f32.gmra.mxu1 %vm209_vm5, %v190_v7  ;;  %v1530_v61 = vld [vmem:[%s1960_s1 + $0xc0] sm:$0xff]  ;;  %v1542_v7 = vld [vmem:[%s1960_s1 + $0xf0] sm:$0xff] }
  0xac   : > { %682 = vmatprep.mubr.f32.mxu1 %v1605_v16 }
  0xad   : > { %1139 = vrot.lane.b32.xlu1 %v1129_v0, %s1611_s25 }
  0xaf   : > { %1143 = vrot.lane.b32.xlu0 %v1130_v10, %s1611_s25  ;;  %v1551_v10 = vld [vmem:[%s1960_s1 + $0x108] sm:$0xff] }
  0xb1   : > { %1284 = vrot.lane.b32.xlu1 %v1271_v11, %s1612_s26  ;;  %v1552_v11 = vld [vmem:[%s1960_s1 + $0x110] sm:$0xff] }
  0xb3   : > { %1282 = vrot.lane.b32.xlu0 %v1279_v12, %s1612_s26  ;;  %v1553_v12 = vld [vmem:[%s1960_s1 + $0x118] sm:$0xff] }
  0xb7   : > { %1280 = vrot.lane.b32.xlu0 %v1270_v9, %s1612_s26  ;;  %v1543_v9 = vld [vmem:[%s1960_s1 + $0xf8] sm:$0xff] }
  0xfe   : > { %v457_v13 = vpop.permute.xlu1 %456 }
 0x101   : > { %v455_v14 = vpop.permute.xlu0 %454 }
 0x102   : > { %v460_v15 = vsel %vm458_vm8, %v455_v14, %v457_v13 }
 0x103   : > { %1494 = vmatprep.subr.msk.mxu0 %vm222_vm3, %v460_v15  ;;  %v594_v17 = vpop.permute.xlu1 %593 }
 0x105   : > { %v453_v18 = vpop.permute.xlu0 %452 }
 0x106   : > { %v459_v20 = vsel %vm458_vm8, %v453_v18, %v455_v14 }
 0x107   : > { %1495 = vmatpush1.msk.msra.mxu0 %vm222_vm3, %v459_v20  ;;  %v596_v21 = vpop.permute.xlu1 %595 }
 0x108   : > { %1496 = vmatmul.mubr.msk.f32.vlgmr.msra.gmra.mxu0 %vm209_vm5, %v1490_v19  ;;  %v600_v22 = vsel %vm599_vm9, %v594_v17, %v596_v21 }
 0x109   : > { %v598_v23 = vpop.permute.xlu0 %597  ;;  %547 = vmatprep.mubr.f32.mxu0 %v1605_v16 }
 0x10a   : > { %v601_v25 = vsel %vm599_vm9, %v596_v21, %v598_v23 }
 0x10b   : > { %1504 = vmatprep.subr.msk.mxu1 %vm222_vm3, %v601_v25  ;;  %v730_v27 = vpop.permute.xlu1 %729 }
 0x10c   : > { %1497 = vmatmul.mubr.msk.f32.gmra.mxu0 %vm209_vm5, %v1491_v24  ;;  %1505 = vmatpush1.msk.msra.mxu1 %vm222_vm3, %v600_v22 }
 0x10d   : > { %v728_v28 = vpop.permute.xlu0 %727  ;;  %1506 = vmatmul.mubr.msk.f32.vlgmr.msra.gmra.mxu1 %vm209_vm5, %v1500_v26  ;;  %553 = vmatprep.mubr.f32.mxu0 %v1605_v16 }
 0x10e   : > { %v733_v30 = vsel %vm731_vm10, %v728_v28, %v730_v27  ;;  %688 = vmatprep.mubr.f32.mxu1 %v1605_v16 }
 0x10f   : > { %1514 = vmatprep.subr.msk.mxu0 %vm222_vm3, %v733_v30  ;;  %v867_v32 = vpop.permute.xlu1 %866 }
 0x110   : > { %1498 = vmatmul.mubr.msk.f32.gmra.mxu0 %vm209_vm5, %v1492_v29 }
 0x111   : > { %v726_v33 = vpop.permute.xlu0 %725  ;;  %1507 = vmatmul.mubr.msk.f32.gmra.mxu1 %vm209_vm5, %v1501_v31  ;;  %559 = vmatprep.mubr.f32.mxu0 %v1605_v16 }
 0x112   : > { %v732_v35 = vsel %vm731_vm10, %v726_v33, %v728_v28  ;;  %694 = vmatprep.mubr.f32.mxu1 %v1605_v16 }
 0x113   : > { %1515 = vmatpush1.msk.msra.mxu0 %vm222_vm3, %v732_v35  ;;  %v869_v37 = vpop.permute.xlu1 %868 }
 0x114   : > { %1499 = vmatmul.mubr.msk.f32.gmra.mxu0 %vm209_vm5, %v1493_v34  ;;  %v873_v39 = vsel %vm872_vm11, %v867_v32, %v869_v37 }
 0x115   : > { %v871_v38 = vpop.permute.xlu0 %870  ;;  %1508 = vmatmul.mubr.msk.f32.gmra.mxu1 %vm209_vm5, %v1502_v36  ;;  %814 = vmatprep.mubr.f32.mxu0 %v1605_v16 }
 0x116   : > { %v874_v41 = vsel %vm872_vm11, %v869_v37, %v871_v38  ;;  %700 = vmatprep.mubr.f32.mxu1 %v1605_v16 }
 0x117   : > { %1524 = vmatprep.subr.msk.mxu1 %vm222_vm3, %v874_v41  ;;  %v1012_v43 = vpop.permute.xlu1 %1011 }
 0x118   : > { %1516 = vmatmul.mubr.msk.f32.vlgmr.msra.gmra.mxu0 %vm209_vm5, %v1510_v40  ;;  %1525 = vmatpush1.msk.msra.mxu1 %vm222_vm3, %v873_v39 }
 0x119   : > { %v1010_v44 = vpop.permute.xlu0 %1009  ;;  %1509 = vmatmul.mubr.msk.f32.gmra.mxu1 %vm209_vm5, %v1503_v42  ;;  %820 = vmatprep.mubr.f32.mxu0 %v1605_v16 }
 0x11a   : > { %v1015_v46 = vsel %vm1013_vm12, %v1010_v44, %v1012_v43  ;;  %955 = vmatprep.mubr.f32.mxu1 %v1605_v16 }
 0x11b   : > { %1534 = vmatprep.subr.msk.mxu0 %vm222_vm3, %v1015_v46  ;;  %v1142_v48 = vpop.permute.xlu1 %1141 }
 0x11c   : > { %1517 = vmatmul.mubr.msk.f32.gmra.mxu0 %vm209_vm5, %v1511_v45 }
 0x11d   : > { %v1008_v49 = vpop.permute.xlu0 %1007  ;;  %1526 = vmatmul.mubr.msk.f32.vlgmr.msra.gmra.mxu1 %vm209_vm5, %v1520_v47  ;;  %826 = vmatprep.mubr.f32.mxu0 %v1605_v16 }
 0x11e   : > { %v1014_v51 = vsel %vm1013_vm12, %v1008_v49, %v1010_v44  ;;  %961 = vmatprep.mubr.f32.mxu1 %v1605_v16 }
 0x11f   : > { %1535 = vmatpush1.msk.msra.mxu0 %vm222_vm3, %v1014_v51  ;;  %v1140_v53 = vpop.permute.xlu1 %1139 }
 0x120   : > { %1518 = vmatmul.mubr.msk.f32.gmra.mxu0 %vm209_vm5, %v1512_v50  ;;  %v1146_v56 = vsel %vm1145_vm13, %v1140_v53, %v1142_v48 }
 0x121   : > { %v1144_v54 = vpop.permute.xlu0 %1143  ;;  %1527 = vmatmul.mubr.msk.f32.gmra.mxu1 %vm209_vm5, %v1521_v52  ;;  %832 = vmatprep.mubr.f32.mxu0 %v1605_v16 }
 0x122   : > { %v1147_v57 = vsel %vm1145_vm13, %v1142_v48, %v1144_v54  ;;  %967 = vmatprep.mubr.f32.mxu1 %v1605_v16 }
 0x123   : > { %v1285_v59 = vpop.permute.xlu1 %1284  ;;  %1544 = vmatprep.subr.msk.mxu1 %vm222_vm3, %v1147_v57 }
 0x124   : > { %1519 = vmatmul.mubr.msk.f32.gmra.mxu0 %vm209_vm5, %v1513_v55  ;;  %1545 = vmatpush1.msk.msra.mxu1 %vm222_vm3, %v1146_v56 }
 0x125   : > { %v1283_v60 = vpop.permute.xlu0 %1282  ;;  %1528 = vmatmul.mubr.msk.f32.gmra.mxu1 %vm209_vm5, %v1522_v58  ;;  %1096 = vmatprep.mubr.f32.mxu0 %v1605_v16 }
 0x126   : > { %v1288_v62 = vsel %vm1286_vm14, %v1283_v60, %v1285_v59  ;;  %973 = vmatprep.mubr.f32.mxu1 %v1605_v16 }
 0x127   : > { %1554 = vmatprep.subr.msk.mxu0 %vm222_vm3, %v1288_v62 }
 0x128   : > { %1536 = vmatmul.mubr.msk.f32.vlgmr.msra.gmra.mxu0 %vm209_vm5, %v1530_v61 }
 0x129   : > { %v1281_v0 = vpop.permute.xlu0 %1280  ;;  %1529 = vmatmul.mubr.msk.f32.gmra.mxu1 %vm209_vm5, %v1523_v63  ;;  %1102 = vmatprep.mubr.f32.mxu0 %v1605_v16 }
 0x12a   : > { %v1287_v2 = vsel %vm1286_vm14, %v1281_v0, %v1283_v60  ;;  %1228 = vmatprep.mubr.f32.mxu1 %v1605_v16 }
 0x12b   : > { %1555 = vmatpush1.msk.msra.mxu0 %vm222_vm3, %v1287_v2 }
 0x12c   : > { %1537 = vmatmul.mubr.msk.f32.gmra.mxu0 %vm209_vm5, %v1531_v1 }
 0x12d   : > { %1546 = vmatmul.mubr.msk.f32.vlgmr.msra.gmra.mxu1 %vm209_vm5, %v1540_v3  ;;  %1108 = vmatprep.mubr.f32.mxu0 %v1605_v16 }
 0x12e   : > { %1234 = vmatprep.mubr.f32.mxu1 %v1605_v16 }
 0x130   : > { %1538 = vmatmul.mubr.msk.f32.gmra.mxu0 %vm209_vm5, %v1532_v4 }
 0x131   : > { %1547 = vmatmul.mubr.msk.f32.gmra.mxu1 %vm209_vm5, %v1541_v5  ;;  %1114 = vmatprep.mubr.f32.mxu0 %v1605_v16 }
 0x132   : > { %1240 = vmatprep.mubr.f32.mxu1 %v1605_v16 }
 0x134   : > { %1539 = vmatmul.mubr.msk.f32.gmra.mxu0 %vm209_vm5, %v1533_v6 }
 0x135   : > { %1548 = vmatmul.mubr.msk.f32.gmra.mxu1 %vm209_vm5, %v1542_v7  ;;  %1369 = vmatprep.mubr.f32.mxu0 %v1605_v16 }
 0x136   : > { %1246 = vmatprep.mubr.f32.mxu1 %v1605_v16 }
 0x138   : > { %1556 = vmatmul.mubr.msk.f32.vlgmr.msra.gmra.mxu0 %vm209_vm5, %v1550_v8 }
 0x139   : > { %1549 = vmatmul.mubr.msk.f32.gmra.mxu1 %vm209_vm5, %v1543_v9  ;;  %1375 = vmatprep.mubr.f32.mxu0 %v1605_v16 }
 0x13c   : > { %1557 = vmatmul.mubr.msk.f32.gmra.mxu0 %vm209_vm5, %v1551_v10 }
 0x13d   : > { %1381 = vmatprep.mubr.f32.mxu0 %v1605_v16 }
 0x140   : > { %1558 = vmatmul.mubr.msk.f32.gmra.mxu0 %vm209_vm5, %v1552_v11 }
 0x141   : > { %1387 = vmatprep.mubr.f32.mxu0 %v1605_v16 }
 0x144   : > { %1559 = vmatmul.mubr.msk.f32.gmra.mxu0 %vm209_vm5, %v1553_v12 }
 0x157   : > { %v1894_v13 = vpop.f32.mrf.mxu1 }
 0x159   : > { %v1896_v14 = vpop.f32.mrf.mxu1 }
 0x15b   : > { %v1898_v15 = vpop.f32.mrf.mxu1 }
 0x15c   : > { %v293_v21 = vpop.f32.mrf.mxu0 }
 0x15d   : > { %v1900_v17 = vpop.f32.mrf.mxu1 }
 0x15e   : > { %v295_v16 = vpop.f32.mrf.mxu0 }
 0x15f   : > { %v400_v18 = vpop.f32.mrf.mxu1 }
 0x160   : > { %v299_v24 = vpop.f32.mrf.mxu0  ;;  %v401_v62 = vadd.f32 %v400_v18, %v293_v21 }
 0x161   : > { %v402_v19 = vpop.f32.mrf.mxu1 }
 0x162   : > { %v301_v26 = vpop.f32.mrf.mxu0  ;;  %v403_v1 = vadd.f32 %v402_v19, %v295_v16 }
 0x163   : > { %v406_v20 = vpop.f32.mrf.mxu1 }
 0x164   : > { %v407_v5 = vadd.f32 %v406_v20, %v299_v24 }
 0x165   : > { %v408_v22 = vpop.f32.mrf.mxu1 }
 0x166   : > { %v409_v10 = vadd.f32 %v408_v22, %v301_v26 }
 0x167   : > { %v412_v23 = vpop.f32.mrf.mxu1 }
 0x168   : > { %v413_v18 = vadd.f32 %v412_v23, %v1894_v13 }
 0x169   : > { %v414_v25 = vpop.f32.mrf.mxu1 }
 0x16a   : > { %v415_v20 = vadd.f32 %v414_v25, %v1896_v14 }
 0x16b   : > { %v1902_v27 = vpop.f32.mrf.mxu1 }
 0x16d   : > { %v1904_v30 = vpop.f32.mrf.mxu1 }
 0x16e   : > { %v421_v14 = vadd.f32 %v1904_v30, %v1900_v17 }
 0x1c8   : > { %v543_v28 = vpop.f32.mrf.mxu0 }
 0x1c9   : > { %v566_v2 = vadd.f32 %v543_v28, %v401_v62 }
 0x1ca   : > { %v545_v29 = vpop.f32.mrf.mxu0 }
 0x1cb   : > { %v567_v6 = vadd.f32 %v545_v29, %v403_v1 }
 0x1cc   : > { %v549_v31 = vpop.f32.mrf.mxu0 }
 0x1cd   : > { %v684_v32 = vpop.f32.mrf.mxu1  ;;  %v568_v11 = vadd.f32 %v549_v31, %v407_v5  ;;  %v419_v31 = vadd.f32 %v1902_v27, %v1898_v15 }
 0x1ce   : > { %v551_v33 = vpop.f32.mrf.mxu0  ;;  %v707_v7 = vadd.f32 %v684_v32, %v566_v2 }
 0x1cf   : > { %v686_v34 = vpop.f32.mrf.mxu1 }
 0x1d0   : > { %v555_v35 = vpop.f32.mrf.mxu0  ;;  %v708_v12 = vadd.f32 %v686_v34, %v567_v6 }
 0x1d1   : > { %v690_v36 = vpop.f32.mrf.mxu1  ;;  %v570_v24 = vadd.f32 %v555_v35, %v413_v18 }
 0x1d2   : > { %v557_v37 = vpop.f32.mrf.mxu0 }
 0x1d3   : > { %v692_v38 = vpop.f32.mrf.mxu1  ;;  %v571_v34 = vadd.f32 %v557_v37, %v415_v20 }
 0x1d4   : > { %v1906_v39 = vpop.f32.mrf.mxu0 }
 0x1d5   : > { %v696_v40 = vpop.f32.mrf.mxu1  ;;  %v572_v25 = vadd.f32 %v1906_v39, %v419_v31 }
 0x1d6   : > { %v1908_v41 = vpop.f32.mrf.mxu0  ;;  %v711_v13 = vadd.f32 %v696_v40, %v570_v24 }
 0x1d7   : > { %v1910_v42 = vpop.f32.mrf.mxu1 }
 0x1d8   : > { %v816_v43 = vpop.f32.mrf.mxu0  ;;  %v712_v35 = vadd.f32 %v1910_v42, %v571_v34 }
 0x1d9   : > { %v1912_v44 = vpop.f32.mrf.mxu1 }
 0x1da   : > { %v818_v45 = vpop.f32.mrf.mxu0  ;;  %v713_v17 = vadd.f32 %v1912_v44, %v572_v25 }
 0x1db   : > { %v1914_v46 = vpop.f32.mrf.mxu1  ;;  %v840_v19 = vadd.f32 %v818_v45, %v708_v12 }
 0x1dc   : > { %v822_v47 = vpop.f32.mrf.mxu0 }
 0x1dd   : > { %v957_v48 = vpop.f32.mrf.mxu1 }
 0x1de   : > { %v824_v49 = vpop.f32.mrf.mxu0 }
 0x1df   : > { %v959_v50 = vpop.f32.mrf.mxu1 }
 0x1e0   : > { %v828_v51 = vpop.f32.mrf.mxu0  ;;  %v981_v22 = vadd.f32 %v959_v50, %v840_v19 }
 0x1e1   : > { %v963_v52 = vpop.f32.mrf.mxu1 }
 0x1e2   : > { %v830_v53 = vpop.f32.mrf.mxu0 }
 0x1e3   : > { %v965_v54 = vpop.f32.mrf.mxu1  ;;  %v844_v30 = vadd.f32 %v830_v53, %v712_v35 }
 0x1e4   : > { %v1916_v55 = vpop.f32.mrf.mxu0 }
 0x1e5   : > { %v969_v56 = vpop.f32.mrf.mxu1 }
 0x1e6   : > { %v1918_v57 = vpop.f32.mrf.mxu0 }
 0x1e7   : > { %1963 = vst [vmem:[#allocation2_spill] sm:$0xff] %v1918_v57  ;;  %v1920_v58 = vpop.f32.mrf.mxu1  ;;  %v839_v57 = vadd.f32 %v816_v43, %v707_v7 }
 0x1e8   : > { %1964 = vst [vmem:[#allocation3_spill] sm:$0xff] %v1920_v58  ;;  %v1098_v59 = vpop.f32.mrf.mxu0  ;;  %v709_v58 = vadd.f32 %v690_v36, %v568_v11 }
 0x1e9   : > { %v1922_v60 = vpop.f32.mrf.mxu1  ;;  %v980_v16 = vadd.f32 %v957_v48, %v839_v57 }
 0x1ea   : > { %1965 = vst [vmem:[#allocation4_spill] sm:$0xff] %v1922_v60  ;;  %v1100_v61 = vpop.f32.mrf.mxu0  ;;  %v841_v62 = vadd.f32 %v822_v47, %v709_v58 }
 0x1eb   : > { %v1924_v63 = vpop.f32.mrf.mxu1  ;;  %v1121_v26 = vadd.f32 %v1098_v59, %v980_v16  ;;  %v1122_v45 = vadd.f32 %v1100_v61, %v981_v22 }
 0x1ec   : > { %1966 = vst [vmem:[#allocation5_spill] sm:$0xff] %v1924_v63  ;;  %v1104_v0 = vpop.f32.mrf.mxu0  ;;  %v569_v63 = vadd.f32 %v551_v33, %v409_v10  ;;  %v982_v43 = vadd.f32 %v963_v52, %v841_v62 }
 0x1ed   : > { %v1230_v3 = vpop.f32.mrf.mxu1 }
 0x1ee   : > { %v1106_v4 = vpop.f32.mrf.mxu0  ;;  %v710_v32 = vadd.f32 %v692_v38, %v569_v63  ;;  %v1253_v48 = vadd.f32 %v1230_v3, %v1121_v26  ;;  %v843_v38 = vadd.f32 %v828_v51, %v711_v13  ;;  %v1123_v37 = vadd.f32 %v1104_v0, %v982_v43  ;;  %v1968_v53 = vld [vmem:[#allocation2_spill] sm:$0xff] }
 0x1ef   : > { %v1232_v8 = vpop.f32.mrf.mxu1  ;;  %v1967_v61 = vld [vmem:[#allocation3_spill] sm:$0xff] }
 0x1f0   : > { %v1110_v9 = vpop.f32.mrf.mxu0  ;;  %v842_v36 = vadd.f32 %v824_v49, %v710_v32  ;;  %v1254_v40 = vadd.f32 %v1232_v8, %v1122_v45  ;;  %v573_v49 = vadd.f32 %v1908_v41, %v421_v14  ;;  %v984_v50 = vadd.f32 %v969_v56, %v843_v38 }
 0x1f1   : > { %v1236_v60 = vpop.f32.mrf.mxu1  ;;  %v985_v63 = vadd.f32 %v1967_v61, %v844_v30 }
 0x1f2   : > { %v1112_v21 = vpop.f32.mrf.mxu0  ;;  %v983_v27 = vadd.f32 %v965_v54, %v842_v36  ;;  %v1255_v52 = vadd.f32 %v1236_v60, %v1123_v37  ;;  %v714_v58 = vadd.f32 %v1914_v46, %v573_v49  ;;  %v845_v54 = vadd.f32 %v1916_v55, %v713_v17  ;;  %v1969_v60 = vld [vmem:[#allocation4_spill] sm:$0xff] }
 0x1f3   : > { %v1238_v28 = vpop.f32.mrf.mxu1  ;;  %v1125_v41 = vadd.f32 %v1110_v9, %v984_v50  ;;  %v1970_v6 = vld [vmem:[#allocation5_spill] sm:$0xff] }
 0x1f4   : > { %v1116_v29 = vpop.f32.mrf.mxu0  ;;  %v1124_v51 = vadd.f32 %v1106_v4, %v983_v27  ;;  %v846_v1 = vadd.f32 %v1968_v53, %v714_v58  ;;  %v986_v3 = vadd.f32 %v1969_v60, %v845_v54  ;;  %v1126_v4 = vadd.f32 %v1112_v21, %v985_v63 }
 0x1f5   : > { %v1242_v23 = vpop.f32.mrf.mxu1 }
 0x1f6   : > { %v1118_v33 = vpop.f32.mrf.mxu0  ;;  %v1256_v0 = vadd.f32 %v1238_v28, %v1124_v51  ;;  %v1257_v5 = vadd.f32 %v1242_v23, %v1125_v41  ;;  %v987_v7 = vadd.f32 %v1970_v6, %v846_v1  ;;  %v1127_v8 = vadd.f32 %v1116_v29, %v986_v3 }
 0x1f7   : > { %v1244_v39 = vpop.f32.mrf.mxu1 }
 0x1f8   : > { %v1371_v15 = vpop.f32.mrf.mxu0  ;;  %v1258_v9 = vadd.f32 %v1244_v39, %v1126_v4  ;;  %v1128_v18 = vadd.f32 %v1118_v33, %v987_v7 }
 0x1f9   : > { %v1394_v47 = vadd.f32 %v1371_v15, %v1253_v48  ;;  %v1248_v56 = vpop.f32.mrf.mxu1 }
 0x1fa   : > { %v1373_v42 = vpop.f32.mrf.mxu0  ;;  %v1259_v19 = vadd.f32 %v1248_v56, %v1127_v8 }
 0x1fb   : > { %1402 = vst [vmem:[%s1938_s7] sm:$0xff] %v1394_v47  ;;  %v1395_v57 = vadd.f32 %v1373_v42, %v1254_v40  ;;  %v1250_v11 = vpop.f32.mrf.mxu1 }
 0x1fc   : > { %v1377_v59 = vpop.f32.mrf.mxu0  ;;  %v1260_v28 = vadd.f32 %v1250_v11, %v1128_v18 }
 0x1fd   : > { %1403 = vst [vmem:[%s1938_s7 + $0x8] sm:$0xff] %v1395_v57  ;;  %v1396_v44 = vadd.f32 %v1377_v59, %v1255_v52 }
 0x1fe   : > { %v1379_v2 = vpop.f32.mrf.mxu0 }
 0x1ff   : > { %1404 = vst [vmem:[%s1938_s7 + $0x10] sm:$0xff] %v1396_v44  ;;  %v1397_v46 = vadd.f32 %v1379_v2, %v1256_v0 }
 0x200   : > { %v1383_v55 = vpop.f32.mrf.mxu0 }
 0x201   : > { %1405 = vst [vmem:[%s1938_s7 + $0x18] sm:$0xff] %v1397_v46  ;;  %v1398_v10 = vadd.f32 %v1383_v55, %v1257_v5 }
 0x202   : > { %v1385_v12 = vpop.f32.mrf.mxu0 }
 0x203   : > { %1406 = vst [vmem:[%s1938_s7 + $0x20] sm:$0xff] %v1398_v10  ;;  %v1399_v16 = vadd.f32 %v1385_v12, %v1258_v9 }
 0x204   : > { %v1389_v21 = vpop.f32.mrf.mxu0 }
 0x205   : > { %1407 = vst [vmem:[%s1938_s7 + $0x28] sm:$0xff] %v1399_v16  ;;  %v1400_v20 = vadd.f32 %v1389_v21, %v1259_v19 }
 0x206   : > { %v1391_v24 = vpop.f32.mrf.mxu0 }
 0x207   : > { %1408 = vst [vmem:[%s1938_s7 + $0x30] sm:$0xff] %v1400_v20  ;;  %v1401_v32 = vadd.f32 %v1391_v24, %v1260_v28 }
 0x209   : > { %1409 = vst [vmem:[%s1938_s7 + $0x38] sm:$0xff] %v1401_v32 }
 0x20a PF: > { %s13_s12 = sadd.s32 1, %s1597_s12  }
 0x20b   : > { %p10_p4 = scmp.ge.s32.totalorder %s13_s12, 4  }
 0x20d   :  { %12 = sbr.rel (!%p10_p4) target bundleno = 1 (0x1), region = 71 }

</bundles_post_ra>
